<compile_context>
chip_gen: v7x
topology: tpu7x:2x2x1
jax: 0.10.0
libtpu: 0.0.40
codegen_flags: <defaults>
</compile_context>

<pallas_src>
import functools
import math

import jax
import jax.numpy as jnp
from jax.experimental import pallas as pl
from jax.experimental.pallas import tpu as pltpu


def cell_embed_kernel(idx_ref, p_ref, out_ref, *, num_valid):
    # idx_ref: (tm, 1) int32
    # p_ref:   (4, E) f32  rows = [hot/valid, off/valid, hot/invalid, off/invalid]
    # out_ref: (tm, E) f32
    tm, e = out_ref.shape

    idx = idx_ref[...]                                           # (tm, 1) i32
    idx_b = jnp.broadcast_to(idx, (tm, e))                       # (tm, E) i32
    lane = jax.lax.broadcasted_iota(jnp.int32, (tm, e), 1)       # column index

    hot = lane == idx_b                                          # one-hot mask
    valid = jnp.logical_and(idx_b >= 0, idx_b < num_valid)       # row validity

    on_val = jnp.where(valid, p_ref[0:1, :], p_ref[2:3, :])      # hot-lane value
    off_val = jnp.where(valid, p_ref[1:2, :], p_ref[3:4, :])     # off-lane value
    out_ref[...] = jnp.where(hot, on_val, off_val).astype(out_ref.dtype)


def _round_up(x, m):
    return ((x + m - 1) // m) * m


def cell_embed(cell_index, ln_weight, ln_bias, *, num_cells, eps=1e-5, tm=None):
    """JAX wrapper matching CellEmbed.forward: eye-table gather + LayerNorm."""
    orig_shape = cell_index.shape
    embed_dim = ln_weight.shape[-1]
    e = embed_dim

    flat = cell_index.reshape(-1).astype(jnp.int32)
    m = flat.shape[0]

    if tm is None:
        # Big tiles amortize per-grid-step overhead; keep >= 2 steps so the
        # "parallel" grid axis can be sharded across TensorCores; never
        # over-pad tiny M.  Cap keeps double-buffered VMEM well under limits.
        tm = min(4096, max(8, _round_up(pl.cdiv(m, 2), 8)))

    mp = _round_up(m, tm)
    pad = mp - m
    if pad:
        flat = jnp.pad(flat, (0, pad))   # filler rows computed, sliced off below
    idx2d = flat.reshape(mp, 1)

    # Fold the closed-form LayerNorm of a one-hot row into four affine row
    # vectors, computed once outside the kernel:
    #   valid idx   : out = (onehot - 1/E) * c1 * w + b,  c1 = rsqrt(var1+eps)
    #   invalid idx : out =  onehot        * c0 * w + b,  c0 = rsqrt(eps)
    w = ln_weight.reshape(1, e).astype(jnp.float32)
    b = ln_bias.reshape(1, e).astype(jnp.float32)
    var1 = (e - 1.0) / float(e * e)
    c1 = 1.0 / math.sqrt(var1 + eps)
    c0 = 1.0 / math.sqrt(eps)
    mean1 = 1.0 / e
    params = jnp.concatenate(
        [
            (1.0 - mean1) * c1 * w + b,   # row 0: hot lane,  valid idx
            (0.0 - mean1) * c1 * w + b,   # row 1: off lanes, valid idx
            c0 * w + b,                   # row 2: hot lane,  invalid idx (< E)
            b,                            # row 3: off lanes, invalid idx
        ],
        axis=0,
    )                                      # (4, E) f32

    out = pl.pallas_call(
        functools.partial(cell_embed_kernel, num_valid=min(num_cells, e)),
        out_shape=jax.ShapeDtypeStruct((mp, e), jnp.float32),
        grid_spec=pltpu.PrefetchScalarGridSpec(
            num_scalar_prefetch=0,
            grid=(mp // tm,),
            in_specs=[
                pl.BlockSpec((tm, 1), lambda i: (i, 0)),    # indices tile
                pl.BlockSpec((4, e), lambda i: (0, 0)),     # fused LN params
            ],
            out_specs=pl.BlockSpec((tm, e), lambda i: (i, 0)),
        ),
        compiler_params=pltpu.CompilerParams(
            dimension_semantics=("parallel",)),
    )(idx2d, params)

    if pad:
        out = out[:m]
    return out.reshape(orig_shape + (e,))


def reference(cell_index, table, weight, bias, eps=1e-5):
    x = table[cell_index]
    mean = jnp.mean(x, axis=-1, keepdims=True)
    var = jnp.mean((x - mean) ** 2, axis=-1, keepdims=True)
    return (x - mean) * jax.lax.rsqrt(var + eps) * weight + bias


if __name__ == "__main__":
    # Module config: shape[-1] = num_cells = 16, embed_dim = 32.
    num_cells = 16
    embed_dim = 32

    key_w, key_b, key_i, key_i2 = jax.random.split(jax.random.PRNGKey(0), 4)

    # Explicit eye table only used by the pure-JAX reference.
    table = jnp.eye(num_cells, embed_dim, dtype=jnp.float32)
    # Non-trivial (but deterministic) LayerNorm affine params.
    ln_weight = 1.0 + 0.1 * jax.random.normal(key_w, (embed_dim,), jnp.float32)
    ln_bias = 0.1 * jax.random.normal(key_b, (embed_dim,), jnp.float32)

    # Small example input: batch=2, seq=8 cell indices.
    cell_index = jax.random.randint(key_i, (2, 8), 0, num_cells, dtype=jnp.int32)

    out = cell_embed(cell_index, ln_weight, ln_bias, num_cells=num_cells)
    out = jax.block_until_ready(out)
    ref = reference(cell_index, table, ln_weight, ln_bias)
    assert out.shape == (2, 8, embed_dim)
    assert jnp.allclose(out, ref, atol=1e-5, rtol=1e-5)

    # Second check: larger flattened index set exercises the big-tile path
    # (tm > 1000, multi-step grid, padding + slice-off).
    cell_index2 = jax.random.randint(key_i2, (4, 600), 0, num_cells, dtype=jnp.int32)
    out2 = cell_embed(cell_index2, ln_weight, ln_bias, num_cells=num_cells)
    out2 = jax.block_until_ready(out2)
    ref2 = reference(cell_index2, table, ln_weight, ln_bias)
    assert out2.shape == (4, 600, embed_dim)
    assert jnp.allclose(out2, ref2, atol=1e-5, rtol=1e-5)

    print("KERNEL_OK")
</pallas_src>

<mosaic_0001>
module attributes {stable_mosaic.version = 11 : i64} {
  func.func @cell_embed_kernel(%arg0: i32, %arg1: memref<8x1xi32, #tpu.memory_space<vmem>>, %arg2: memref<4x32xf32, #tpu.memory_space<vmem>>, %arg3: memref<8x32xf32, #tpu.memory_space<vmem>>) attributes {dimension_semantics = [#tpu.dimension_semantics<parallel>], iteration_bounds = array<i64: 2>, scalar_prefetch = 0 : i64, scratch_operands = 0 : i64, tpu.core_type = #tpu.core_type<tc>, window_params = [{transform_indices = @transform_0, window_bounds = array<i64: 8, 1>}, {pipeline_mode = #tpu.pipeline_mode<synchronous>, transform_indices = @transform_1, window_bounds = array<i64: 4, 32>}, {transform_indices = @transform_2, window_bounds = array<i64: 8, 32>}]} {
    %c0 = arith.constant 0 : index
    %c0_0 = arith.constant 0 : index
    %0 = vector.load %arg1[%c0, %c0_0] : memref<8x1xi32, #tpu.memory_space<vmem>>, vector<8x1xi32>
    %1 = vector.shape_cast %0 : vector<8x1xi32> to vector<8x1xi32>
    %2 = vector.broadcast %1 : vector<8x1xi32> to vector<8x32xi32>
    %3 = tpu.iota {dimensions = array<i32: 1>} : vector<8x32xi32>
    %4 = arith.cmpi eq, %3, %2 : vector<8x32xi32>
    %c0_i32 = arith.constant 0 : i32
    %5 = vector.broadcast %c0_i32 : i32 to vector<8x32xi32>
    %6 = arith.cmpi sge, %2, %5 : vector<8x32xi32>
    %c16_i32 = arith.constant 16 : i32
    %7 = vector.broadcast %c16_i32 : i32 to vector<8x32xi32>
    %8 = arith.cmpi slt, %2, %7 : vector<8x32xi32>
    %9 = arith.andi %6, %8 : vector<8x32xi1>
    %c0_1 = arith.constant 0 : index
    %c0_2 = arith.constant 0 : index
    %10 = vector.load %arg2[%c0_1, %c0_2] : memref<4x32xf32, #tpu.memory_space<vmem>>, vector<1x32xf32>
    %c2 = arith.constant 2 : index
    %c0_3 = arith.constant 0 : index
    %11 = vector.load %arg2[%c2, %c0_3] : memref<4x32xf32, #tpu.memory_space<vmem>>, vector<1x32xf32>
    %12 = vector.shape_cast %10 : vector<1x32xf32> to vector<1x32xf32>
    %13 = vector.broadcast %12 : vector<1x32xf32> to vector<8x32xf32>
    %14 = vector.shape_cast %11 : vector<1x32xf32> to vector<1x32xf32>
    %15 = vector.broadcast %14 : vector<1x32xf32> to vector<8x32xf32>
    %16 = arith.select %9, %13, %15 : vector<8x32xi1>, vector<8x32xf32>
    %c1 = arith.constant 1 : index
    %c0_4 = arith.constant 0 : index
    %17 = vector.load %arg2[%c1, %c0_4] : memref<4x32xf32, #tpu.memory_space<vmem>>, vector<1x32xf32>
    %c3 = arith.constant 3 : index
    %c0_5 = arith.constant 0 : index
    %18 = vector.load %arg2[%c3, %c0_5] : memref<4x32xf32, #tpu.memory_space<vmem>>, vector<1x32xf32>
    %19 = vector.shape_cast %17 : vector<1x32xf32> to vector<1x32xf32>
    %20 = vector.broadcast %19 : vector<1x32xf32> to vector<8x32xf32>
    %21 = vector.shape_cast %18 : vector<1x32xf32> to vector<1x32xf32>
    %22 = vector.broadcast %21 : vector<1x32xf32> to vector<8x32xf32>
    %23 = arith.select %9, %20, %22 : vector<8x32xi1>, vector<8x32xf32>
    %24 = arith.select %4, %16, %23 : vector<8x32xi1>, vector<8x32xf32>
    %c0_6 = arith.constant 0 : index
    %c0_7 = arith.constant 0 : index
    %25 = vector.load %arg3[%c0_6, %c0_7] : memref<8x32xf32, #tpu.memory_space<vmem>>, vector<8x32xf32>
    tpu.vector_store %arg3[%c0_6, %c0_7], %24 {strides = array<i32>} : memref<8x32xf32, #tpu.memory_space<vmem>>, vector<8x32xf32>,
    return
  }
  func.func @transform_0(%arg0: i32) -> (i32, i32) {
    %c0_i32 = arith.constant 0 : i32
    %c0_i32_0 = arith.constant 0 : i32
    return %arg0, %c0_i32 : i32, i32
  }
  func.func @transform_1(%arg0: i32) -> (i32, i32) {
    %c0_i32 = arith.constant 0 : i32
    %c0_i32_0 = arith.constant 0 : i32
    %c0_i32_1 = arith.constant 0 : i32
    return %c0_i32, %c0_i32_0 : i32, i32
  }
  func.func @transform_2(%arg0: i32) -> (i32, i32) {
    %c0_i32 = arith.constant 0 : i32
    %c0_i32_0 = arith.constant 0 : i32
    return %arg0, %c0_i32 : i32, i32
  }
}

</mosaic_0001>

<bundles_post_ra>
// kernel: tpu_custom_call.1
= control target key start
LH: loop header
LB: loop body
LE: loop exit
PB: predicated region body
PF: predicated region fallthrough
CT: control target
= control target key end

     0   :  { %7 = vsyncpa [#allocation3], 0  ;;  %s495_s0 = inlined_call_operand.vmem [shape: s32[16,1], index: 0, kind: input, shape index: {}]   ;;  %s496_s1 = inlined_call_operand.vmem [shape: f32[4,32], index: 1, kind: input, shape index: {}]   ;;  %s497_s2 = inlined_call_operand.hbm [shape: f32[16,32], index: 2, kind: output, shape index: {}]  }
   0x1   :  { %9 = vsyncpa [#allocation3 + $0x1], 0  ;;  %s383_s9 = smov 0   ;;  %s385_s10 = smov 0  }
   0x2   :  { %s387_s11 = smov 0   ;;  %s389_s12 = smov 0  }
   0x3 LB: > { %s404_s13 = sadd.s32 4294967295, %s364_s12   ;;  %s247_s14 = sadd.s32 4294967294, %s364_s12   ;;  %s364_s12 = sphi %s389_s12, %s503_s12   ;;  %s360_s11 = sphi %s387_s11, %s502_s11   ;;  %s356_s10 = sphi %s385_s10, %s501_s10   ;;  %s352_s9 = sphi %s383_s9, %s500_s9  }
   0x4   : > { %s408_s15 = sadd.s32 1, %s364_s12   ;;  %s69_s16 = sadd.s32 1, %s360_s11 }
   0x5   : > { %s66_s17 = ssub.s32 %s364_s12, %s408_s15  ;;  %p79_p0 = scmp.ne.s32.totalorder %s360_s11, %s356_s10 }
   0x6   : > { %p67_p1 = scmp.eq.s32.totalorder %s66_s17, 0  ;;  %p80_p2 = scmp.eq.s32.totalorder %s404_s13, 1 }
   0x7   : > { %p85_p3 = scmp.ne.s32.totalorder %s356_s10, %s352_s9  ;;  %p86_p4 = scmp.eq.s32.totalorder %s247_s14, 1 }
   0x8   : > { %s419_s18 = scalar_select %p67_p1, %s360_s11, %s69_s16  }
   0x9   : > { %p421_p5 = por %p80_p2, %p79_p0  ;;  %p425_p6 = por %p86_p4, %p85_p3 }
   0xa   : > { %p250_p7 = scmp.ge.s32.totalorder %s364_s12, 1  ;;  %p114_p8 = scmp.lt.s32.totalorder %s364_s12, 3 }
   0xc   : > { %p115_p9 = pnand %p250_p7, %p114_p8 }
   0xd   : > { %p135_p10 = scmp.lt.s32.totalorder (!%p115_p9), %s404_s13, 1  ;;  %v366_v0 = vmov (!%p115_p9), 0   ;;  %s132_s26 = sand.u32 (!%p115_p9), 1, %s356_s10   ;;  %v143_v2 = vlaneseq (!%p115_p9)  ;;  %v253_v4 = vld [vmem:[%s496_s1] ss:$0 sm:$0xff] (!%p115_p9)  ;;  %vm172_vm3 = vcmask (!%p115_p9), 261120  }
   0xe   : > { %118 = sbr.rel (%p115_p9) target bundleno = 172 (0xac), region = 28  ;;  %301 = vset.pattern.permute.xlu0 (!%p115_p9), %v366_v0  ;;  %s251_s27 = sshll.u32 (!%p115_p9), %s132_s26, 3  ;;  %v254_v5 = vld [vmem:[%s496_s1 + $0x2] ss:$0 sm:$0xff] (!%p115_p9)  ;;  %v255_v6 = vld [vmem:[%s496_s1 + $0x1] ss:$0 sm:$0xff] (!%p115_p9) }
   0xf   : > { %v144_v3 = vand.u32 (!%p115_p9), 127, %v143_v2  ;;  %v256_v7 = vld [vmem:[%s496_s1 + $0x3] ss:$0 sm:$0xff] (!%p115_p9)  ;;  %s258_s8 = sshll.u32 (!%p115_p9), %s404_s13, 7  ;;  %s134_s14 = scalar_lea.vmem (!%p115_p9), [#allocation2], %s251_s27 }
  0x10   : > { %s188_s16 = sshll.u32 (!%p115_p9), %s134_s14, 4  ;;  %s367_s24 = smov (!%p115_p9), [#allocation2]   ;;  %s455_s16 = int_to_ptr.vmem [resolvable:$true] %s188_s16 }
  0x11   : > { %s302_s23 = scalar_lea.vmem (!%p115_p9), %s455_s16, 128 }
  0x12   : > { %p303_p11 = scmp.ne.s32.totalorder (!%p115_p9), %s455_s16, %s302_s23 }
  0x14   : > { %p304_p12 = pnand (!%p115_p9), %p303_p11, %p421_p5 }
  0x15   : > { %s136_s21 = scalar_select %p135_p10, %s404_s13, 1 }
  0x16   : > { %s175_s13 = scalar_lea.sflag [#allocation3], %s132_s26  ;;  %p305_p13 = pneg %p304_p12 }
  0x17   : > { %s252_s22 = sshll.u32 %s136_s21, 3 }
  0x18   : > { %s138_s25 = scalar_lea.vmem %s495_s0, %s252_s22  ;;  %s453_s22 = scalar_lea.hbm %s497_s2, %s258_s8 }
  0x19   : > { %v139_v1 = vld [vmem:[%s138_s25] sm:$0xff]  ;;  %s306_s25 = sshll.u32 %s367_s24, 4  ;;  %s307_s25 = int_to_ptr.vmem [resolvable:$false] %s306_s25 }
  0x1a   : > { %141 = vperm.xlu0 %301, %v139_v1   ;;  %s308_s27 = scalar_lea.vmem %s307_s25, 256  ;;  %p309_p0 = scmp.lt.s32.totalorder %s455_s16, %s307_s25 }
  0x1b   : > { %p310_p1 = scmp.lt.s32.totalorder %s308_s27, %s302_s23 }
  0x1d   : > { %p311_p2 = por %p310_p1, %p309_p0 }
  0x1f   : > { %p312_p3 = pnand %p311_p2, %p305_p13 }
  0x99   : > { %v142_v8 = vpop.permute.xlu0 %141 }
  0x9a   : > { %vm146_vm0 = vcmp.ge.s32.totalorder %v142_v8, 0  ;;  %vm147_vm1 = vcmp.lt.s32.totalorder %v142_v8, 16  ;;  %vm145_vm4 = vcmp.eq.s32.totalorder %v144_v3, %v142_v8 }
  0x9b   : > { %vm148_vm2 = vmand %vm146_vm0, %vm147_vm1 }
  0x9c   : > { %v159_v9 = vsel %vm148_vm2, %v253_v4, %v254_v5  ;;  %v170_v10 = vsel %vm148_vm2, %v255_v6, %v256_v7 }
  0x9d   : > { %v171_v11 = vsel %vm145_vm4, %v159_v9, %v170_v10 }
  0x9e   : > { %173 = vst.msk [vmem:[%s134_s14] sm:$0xff] %vm172_vm3, %v171_v11 }
  0x9f   : > { %315 = shalt.err (!%p312_p3)
}
  0xa0   : > { %s316_s26 = scalar_lea.hbm %s453_s22, 128  ;;  %s320_s30 = scalar_lea.hbm %s497_s2, 256 }
  0xa1   : > { %p317_p4 = scmp.ne.s32.totalorder %s453_s22, %s316_s26  ;;  %p321_p9 = scmp.lt.u32.totalorder %s453_s22, %s497_s2 }
  0xa2   : > { %p322_p10 = scmp.lt.u32.totalorder %s320_s30, %s316_s26  ;;  %p324_p12 = scmp.lt.u32.totalorder %s316_s26, %s453_s22 }
  0xa3   : > { %p318_p7 = pnand %p317_p4, %p421_p5 }
  0xa4   : > { %p323_p11 = por %p322_p10, %p321_p9 }
  0xa5   : > { %p319_p8 = pneg %p318_p7 }
  0xa6   : > { %p325_p13 = por %p324_p12, %p323_p11 }
  0xa8   : > { %p326_p0 = pnand %p325_p13, %p319_p8 }
  0xaa   : > { %329 = shalt.err (!%p326_p0)
}
  0xab   : > { %261 = dma.vmem_to_hbm [thread:$0]  (%p421_p5), %s455_s16, 128, %s453_s22, %s175_s13  }
  0xac PF: > { %p267_p1 = scmp.ge.s32.totalorder %s364_s12, 2  ;;  %s200_s5 = sand.u32 1, %s352_s9  }
  0xad   : > { %s201_s6 = scalar_lea.sflag [#allocation3], %s200_s5 }
  0xae   : > { %p264_p2 = pnand %p267_p1, %p425_p6 }
  0xb0   : > { %347 = dma.done.wait (!%p264_p2), %s201_s6, 128  }
  0xb1   : > { %349 = vsyncadd (!%p264_p2), %s201_s6, 4294967168  ;;  %p12_p3 = scmp.ge.s32.totalorder %s408_s15, 4   ;;  %s500_s9 = smov %s356_s10 }
  0xb2   : > { %s501_s10 = smov %s360_s11  ;;  %s502_s11 = smov %s419_s18 }
  0xb3   : > { %s503_s12 = smov %s408_s15  ;;  %14 = sbr.rel (!%p12_p3) target bundleno = 3 (0x3), region = 63 }
  0xba   :  { %206 = vsyncpa [#allocation3], 1 }
  0xbb   :  { %208 = vsyncpa [#allocation3 + $0x1], 1 }

</bundles_post_ra>
